<compile_context>
chip_gen: v7x
topology: tpu7x:2x2x1
jax: 0.10.0
libtpu: 0.0.40
codegen_flags: <defaults>
</compile_context>

<pallas_src>
import math

import jax
import jax.numpy as jnp
from jax.experimental import pallas as pl
from jax.experimental.pallas import tpu as pltpu
from jax.scipy.linalg import block_diag


def _stl_kernel(x_ref, ws_ref, segmask_ref, wout_ref, out_ref):
    x = x_ref[...]                                                   # [tn, d_q]

    # All-head attention scores in one matmul against the fused, pre-scaled
    # query->key matrix (head-major along lanes).
    s = jnp.dot(x, ws_ref[...],
                preferred_element_type=jnp.float32)                  # [tn, S]

    # Segmented (per-head) softmax over the lane axis.  Subtracting the global
    # row max is valid inside every head segment (constant cancels in the
    # ratio) and keeps exp() <= 1.
    s_max = jnp.max(s, axis=-1, keepdims=True)
    e = jnp.exp(s - s_max)
    # Per-head denominator via the block-diagonal ones mask: stays on the MXU,
    # no lane reshapes / cross-lane shuffles.
    den = jnp.dot(e, segmask_ref[...],
                  preferred_element_type=jnp.float32)                # [tn, S]
    p = e * pl.reciprocal(den, approx=True)

    # One matmul emits the whole lane-dense output slab:
    #   lanes [0:E]     = p @ V_blk   (style embedding, head-major)
    #   lanes [E:E+S]   = p @ I       (attention probabilities)
    #   remaining lanes = 0           (padding)
    out_ref[...] = jnp.dot(p, wout_ref[...],
                           preferred_element_type=jnp.float32
                           ).astype(out_ref.dtype)                   # [tn, P]


def stl_forward(inputs, embed, wq, wk, wv, *, num_heads, row_block=256):
    """inputs: [N, d_q]; returns (style_embed [N,1,E], attention_scores [N,H*T,1]).

    embed: [n_tok, d_k]; wq/wk/wv are PyTorch nn.Linear weights [out, in].
    """
    # TODO(synk): the `target_scores is not None` branch of STL.forward (reuse
    # of externally supplied attention scores) is not implemented here.
    N, d_q = inputs.shape
    E = wq.shape[0]
    n_tok, d_k = embed.shape
    assert E % num_heads == 0 and E // num_heads == d_k
    S = num_heads * n_tok

    f32 = jnp.float32

    # ---- parameter-only precomputation (hoisted off the per-call path) ----
    keys_in = jnp.tanh(embed.astype(f32))                            # [T, d_k]
    k = keys_in @ wk.astype(f32).T                                   # [T, E]
    v = keys_in @ wv.astype(f32).T                                   # [T, E]
    k_heads = [k[:, h * d_k:(h + 1) * d_k] for h in range(num_heads)]
    v_heads = [v[:, h * d_k:(h + 1) * d_k] for h in range(num_heads)]
    # Block-diagonal key matrix, pre-scaled by 1/sqrt(d_k):  [E, S]
    k_blk = block_diag(*[kh.T for kh in k_heads]) * (1.0 / math.sqrt(d_k))
    # Fuse the query projection:  (x @ Wq.T) @ K_blk == x @ (Wq.T @ K_blk).
    w_s = wq.astype(f32).T @ k_blk                                   # [d_q, S]
    # Block-diagonal value matrix:  [S, E]
    v_blk = block_diag(*v_heads)

    # Combined lane-padded output weight [S, P] = [V_blk | I_S | 0].
    P = max(128, ((E + S + 127) // 128) * 128)
    w_out = jnp.concatenate(
        [v_blk.astype(f32),
         jnp.eye(S, dtype=f32),
         jnp.zeros((S, P - E - S), dtype=f32)], axis=1)              # [S, P]

    # Per-head segment mask (block-diagonal ones) for the softmax denominator.
    head_id = jnp.arange(S) // n_tok
    seg_mask = (head_id[:, None] == head_id[None, :]).astype(f32)    # [S, S]

    # ---- row tiling over N ----
    tn = N if N <= row_block else row_block   # full-dim or multiple-of-8 block
    grid = (pl.cdiv(N, tn),)

    slab = pl.pallas_call(
        _stl_kernel,
        out_shape=jax.ShapeDtypeStruct((N, P), f32),
        grid=grid,
        in_specs=[
            pl.BlockSpec((tn, d_q), lambda i: (i, 0)),   # inputs (row-tiled)
            pl.BlockSpec((d_q, S), lambda i: (0, 0)),    # W_s (resident)
            pl.BlockSpec((S, S), lambda i: (0, 0)),      # seg_mask (resident)
            pl.BlockSpec((S, P), lambda i: (0, 0)),      # W_out (resident)
        ],
        out_specs=pl.BlockSpec((tn, P), lambda i: (i, 0)),
        compiler_params=pltpu.CompilerParams(
            dimension_semantics=("parallel",)),
    )(inputs.astype(f32), w_s, seg_mask, w_out)

    style_embed = slab[:, :E][:, None, :]                # [N, 1, E]
    attention_scores = slab[:, E:E + S][:, :, None]      # [N, H*T, 1]
    return style_embed, attention_scores


def _reference(inputs, embed, wq, wk, wv, num_heads):
    """Pure-JAX reference mirroring the PyTorch forward."""
    N = inputs.shape[0]
    n_tok, d_k = embed.shape
    query = inputs[:, None, :]                                   # [N,1,d_q]
    keys = jnp.broadcast_to(jnp.tanh(embed)[None], (N, n_tok, d_k))
    q = query @ wq.T                                             # [N,1,E]
    k = keys @ wk.T                                              # [N,n_tok,E]
    v = keys @ wv.T                                              # [N,n_tok,E]
    qs = jnp.stack(jnp.split(q, num_heads, axis=2), 0)           # [H,N,1,d_k]
    ks = jnp.stack(jnp.split(k, num_heads, axis=2), 0)
    vs = jnp.stack(jnp.split(v, num_heads, axis=2), 0)
    sc = (qs @ jnp.swapaxes(ks, 2, 3)) / (d_k ** 0.5)            # [H,N,1,n_tok]
    sc = jax.nn.softmax(sc, axis=3)
    out = sc @ vs                                                # [H,N,1,d_k]
    out = jnp.concatenate(jnp.split(out, num_heads, 0), axis=3)[0]   # [N,1,E]
    scr = jnp.concatenate(jnp.split(sc, num_heads, 0), axis=3)[0]    # [N,1,H*T]
    scr = jnp.swapaxes(scr, 1, 2)                                    # [N,H*T,1]
    return out, scr


if __name__ == "__main__":
    # Small GST-like config.
    n_style_token = 10
    token_size = 32        # E (num_units)
    attn_head = 4          # H
    gru_hidden = 32        # d_q
    d_k = token_size // attn_head
    N = 2

    key = jax.random.PRNGKey(0)
    k_emb, k_x, k_q, k_k, k_v = jax.random.split(key, 5)

    # Deterministic parameter init (shapes from STL.__init__ / nn.Linear).
    embed = 0.5 * jax.random.normal(k_emb, (n_style_token, d_k), jnp.float32)
    wq = jax.random.uniform(k_q, (token_size, gru_hidden), jnp.float32,
                            -1.0 / math.sqrt(gru_hidden), 1.0 / math.sqrt(gru_hidden))
    wk = jax.random.uniform(k_k, (token_size, d_k), jnp.float32,
                            -1.0 / math.sqrt(d_k), 1.0 / math.sqrt(d_k))
    wv = jax.random.uniform(k_v, (token_size, d_k), jnp.float32,
                            -1.0 / math.sqrt(d_k), 1.0 / math.sqrt(d_k))

    inputs = jax.random.normal(k_x, (N, gru_hidden), jnp.float32)

    style_embed, attn_scores = stl_forward(inputs, embed, wq, wk, wv,
                                           num_heads=attn_head)
    style_embed, attn_scores = jax.block_until_ready((style_embed, attn_scores))

    ref_out, ref_scores = _reference(inputs, embed, wq, wk, wv, attn_head)
    assert style_embed.shape == (N, 1, token_size)
    assert attn_scores.shape == (N, attn_head * n_style_token, 1)
    # Tolerance relaxed vs. 1e-5 because the softmax denominator uses the
    # approximate EUP reciprocal (pl.reciprocal(..., approx=True)).
    assert jnp.allclose(style_embed, ref_out, atol=5e-3, rtol=5e-3)
    assert jnp.allclose(attn_scores, ref_scores, atol=5e-3, rtol=5e-3)

    print("KERNEL_OK")
</pallas_src>

<mosaic_0001>
module attributes {stable_mosaic.version = 11 : i64} {
  func.func @_stl_kernel(%arg0: i32, %arg1: memref<2x32xf32, #tpu.memory_space<vmem>>, %arg2: memref<32x40xf32, #tpu.memory_space<vmem>>, %arg3: memref<40x40xf32, #tpu.memory_space<vmem>>, %arg4: memref<40x128xf32, #tpu.memory_space<vmem>>, %arg5: memref<2x128xf32, #tpu.memory_space<vmem>>) attributes {dimension_semantics = [#tpu.dimension_semantics<parallel>], iteration_bounds = array<i64: 1>, scalar_prefetch = 0 : i64, scratch_operands = 0 : i64, tpu.core_type = #tpu.core_type<tc>, window_params = [{transform_indices = @transform_0, window_bounds = array<i64: 2, 32>}, {pipeline_mode = #tpu.pipeline_mode<synchronous>, transform_indices = @transform_1, window_bounds = array<i64: 32, 40>}, {pipeline_mode = #tpu.pipeline_mode<synchronous>, transform_indices = @transform_2, window_bounds = array<i64: 40, 40>}, {pipeline_mode = #tpu.pipeline_mode<synchronous>, transform_indices = @transform_3, window_bounds = array<i64: 40, 128>}, {transform_indices = @transform_4, window_bounds = array<i64: 2, 128>}]} {
    %c0 = arith.constant 0 : index
    %c0_0 = arith.constant 0 : index
    %0 = vector.load %arg1[%c0, %c0_0] : memref<2x32xf32, #tpu.memory_space<vmem>>, vector<2x32xf32>
    %c0_1 = arith.constant 0 : index
    %c0_2 = arith.constant 0 : index
    %1 = vector.load %arg2[%c0_1, %c0_2] : memref<32x40xf32, #tpu.memory_space<vmem>>, vector<32x40xf32>
    %cst = arith.constant dense<0.000000e+00> : vector<2x40xf32>
    %2 = tpu.matmul %0, %1, %cst {dimension_numbers = #tpu.dot_dimension_numbers<[1], [0], [0], [1], [0, 0, 1, 1], [], []>} : vector<2x32xf32>, vector<32x40xf32>, vector<2x40xf32> -> vector<2x40xf32>
    %cst_3 = arith.constant dense<0xFF800000> : vector<2xf32>
    %3 = vector.multi_reduction <maximumf>, %2, %cst_3 [1] : vector<2x40xf32> to vector<2xf32>
    %4 = vector.shape_cast %3 : vector<2xf32> to vector<2x1xf32>
    %5 = vector.broadcast %4 : vector<2x1xf32> to vector<2x40xf32>
    %6 = arith.subf %2, %5 : vector<2x40xf32>
    %7 = math.exp %6 : vector<2x40xf32>
    %c0_4 = arith.constant 0 : index
    %c0_5 = arith.constant 0 : index
    %8 = vector.load %arg3[%c0_4, %c0_5] : memref<40x40xf32, #tpu.memory_space<vmem>>, vector<40x40xf32>
    %cst_6 = arith.constant dense<0.000000e+00> : vector<2x40xf32>
    %9 = tpu.matmul %7, %8, %cst_6 {dimension_numbers = #tpu.dot_dimension_numbers<[1], [0], [0], [1], [0, 0, 1, 1], [], []>} : vector<2x40xf32>, vector<40x40xf32>, vector<2x40xf32> -> vector<2x40xf32>
    %10 = tpu.reciprocal %9 {approx = true} : vector<2x40xf32> -> vector<2x40xf32>
    %11 = arith.mulf %7, %10 : vector<2x40xf32>
    %c0_7 = arith.constant 0 : index
    %c0_8 = arith.constant 0 : index
    %12 = vector.load %arg4[%c0_7, %c0_8] : memref<40x128xf32, #tpu.memory_space<vmem>>, vector<40x128xf32>
    %cst_9 = arith.constant dense<0.000000e+00> : vector<2x128xf32>
    %13 = tpu.matmul %11, %12, %cst_9 {dimension_numbers = #tpu.dot_dimension_numbers<[1], [0], [0], [1], [0, 0, 1, 1], [], []>} : vector<2x40xf32>, vector<40x128xf32>, vector<2x128xf32> -> vector<2x128xf32>
    %c0_10 = arith.constant 0 : index
    %c0_11 = arith.constant 0 : index
    %14 = vector.load %arg5[%c0_10, %c0_11] : memref<2x128xf32, #tpu.memory_space<vmem>>, vector<2x128xf32>
    tpu.vector_store %arg5[%c0_10, %c0_11], %13 {strides = array<i32>} : memref<2x128xf32, #tpu.memory_space<vmem>>, vector<2x128xf32>,
    return
  }
  func.func @transform_0(%arg0: i32) -> (i32, i32) {
    %c0_i32 = arith.constant 0 : i32
    %c0_i32_0 = arith.constant 0 : i32
    return %arg0, %c0_i32 : i32, i32
  }
  func.func @transform_1(%arg0: i32) -> (i32, i32) {
    %c0_i32 = arith.constant 0 : i32
    %c0_i32_0 = arith.constant 0 : i32
    %c0_i32_1 = arith.constant 0 : i32
    return %c0_i32, %c0_i32_0 : i32, i32
  }
  func.func @transform_2(%arg0: i32) -> (i32, i32) {
    %c0_i32 = arith.constant 0 : i32
    %c0_i32_0 = arith.constant 0 : i32
    %c0_i32_1 = arith.constant 0 : i32
    return %c0_i32, %c0_i32_0 : i32, i32
  }
  func.func @transform_3(%arg0: i32) -> (i32, i32) {
    %c0_i32 = arith.constant 0 : i32
    %c0_i32_0 = arith.constant 0 : i32
    %c0_i32_1 = arith.constant 0 : i32
    return %c0_i32, %c0_i32_0 : i32, i32
  }
  func.func @transform_4(%arg0: i32) -> (i32, i32) {
    %c0_i32 = arith.constant 0 : i32
    %c0_i32_0 = arith.constant 0 : i32
    return %arg0, %c0_i32 : i32, i32
  }
}

</mosaic_0001>

<bundles_post_ra>
// kernel: tpu_custom_call.1
= control target key start
LH: loop header
LB: loop body
LE: loop exit
PB: predicated region body
PF: predicated region fallthrough
CT: control target
= control target key end

     0   :  { %9 = vsyncpa [#allocation3], 0  ;;  %s650_s0 = inlined_call_operand.hbm [shape: f32[2,32], index: 0, kind: input, shape index: {}]   ;;  %s651_s1 = inlined_call_operand.hbm [shape: f32[32,40], index: 1, kind: input, shape index: {}]   ;;  %s652_s2 = inlined_call_operand.hbm [shape: f32[40,40], index: 2, kind: input, shape index: {}]   ;;  %s653_s3 = inlined_call_operand.hbm [shape: f32[40,128], index: 3, kind: input, shape index: {}]   ;;  %s654_s4 = inlined_call_operand.hbm [shape: f32[2,128], index: 4, kind: output, shape index: {}]  }
   0x1   :  { %10 = vsyncpa [#allocation6], 0 }
   0x2   :  { %11 = vsyncpa [#allocation9], 0 }
   0x3   :  { %12 = vsyncpa [#allocation4], 0  ;;  %s541_s15 = smov [#allocation5]   ;;  %s423_s19 = scalar_lea.hbm %s651_s1, 512 }
   0x4   :  { %s28_s16 = sshll.u32 %s541_s15, 4  ;;  %p424_p0 = scmp.ne.s32.totalorder %s651_s1, %s423_s19  ;;  %s29_s16 = int_to_ptr.vmem [resolvable:$true] %s28_s16 }
   0x5   :  { %p427_p1 = scmp.lt.u32.totalorder %s423_s19, %s651_s1 }
   0x7   :  { %p429_p2 = pnand %p427_p1, %p424_p0 }
   0x9   :  { %432 = shalt.err (!%p429_p2)
}
   0xa   :  { %s433_s24 = scalar_lea.vmem %s29_s16, 512  ;;  %p438_p4 = scmp.lt.s32.totalorder %s29_s16, %s29_s16 }
   0xb   :  { %p434_p3 = scmp.ne.s32.totalorder %s29_s16, %s433_s24  ;;  %p439_p5 = scmp.lt.s32.totalorder %s433_s24, %s433_s24 }
   0xd   :  { %p440_p6 = por %p439_p5, %p438_p4 }
   0xf   :  { %p441_p7 = pnand %p440_p6, %p434_p3 }
  0x11   :  { %444 = shalt.err (!%p441_p7)
}
  0x12   :  { %s542_s25 = smov 128   ;;  %s543_s26 = smov 8  }
  0x13   :  { %34 = dma.hbm_to_vmem [thread:$0]  %s651_s1, 512, %s29_s16, [#allocation6], %s542_s25, %s542_s25, %s543_s26  }
  0x14   :  { %s544_s29 = smov [#allocation2]   ;;  %s545_s5 = smov [#allocation7]  }
  0x15   :  { %s19_s30 = sshll.u32 %s544_s29, 4  ;;  %s40_s6 = sshll.u32 %s545_s5, 4  ;;  %s20_s30 = int_to_ptr.vmem [resolvable:$true] %s19_s30  ;;  %s41_s6 = int_to_ptr.vmem [resolvable:$true] %s40_s6 }
  0x16   :  { %s445_s9 = scalar_lea.hbm %s650_s0, 32 }
  0x17   :  { %p446_p8 = scmp.ne.s32.totalorder %s650_s0, %s445_s9  ;;  %p449_p9 = scmp.lt.u32.totalorder %s445_s9, %s650_s0 }
  0x19   :  { %p451_p10 = pnand %p449_p9, %p446_p8 }
  0x1b   :  { %454 = shalt.err (!%p451_p10)
}
  0x1c   :  { %s455_s1 = scalar_lea.vmem %s20_s30, 32  ;;  %p460_p12 = scmp.lt.s32.totalorder %s20_s30, %s20_s30 }
  0x1d   :  { %p456_p11 = scmp.ne.s32.totalorder %s20_s30, %s455_s1  ;;  %p461_p13 = scmp.lt.s32.totalorder %s455_s1, %s455_s1 }
  0x1f   :  { %p462_p0 = por %p461_p13, %p460_p12 }
  0x21   :  { %p463_p1 = pnand %p462_p0, %p456_p11 }
  0x23   :  { %466 = shalt.err (!%p463_p1)
}
  0x24   :  { %22 = dma.hbm_to_vmem [thread:$0]  %s650_s0, 32, %s20_s30, [#allocation3]  }
  0x25   :  { %s467_s18 = scalar_lea.hbm %s652_s2, 640 }
  0x26   :  { %p468_p2 = scmp.ne.s32.totalorder %s652_s2, %s467_s18  ;;  %p471_p3 = scmp.lt.u32.totalorder %s467_s18, %s652_s2 }
  0x28   :  { %p473_p4 = pnand %p471_p3, %p468_p2 }
  0x2a   :  { %476 = shalt.err (!%p473_p4)
}
  0x2b   :  { %s477_s23 = scalar_lea.vmem %s41_s6, 640  ;;  %p482_p6 = scmp.lt.s32.totalorder %s41_s6, %s41_s6 }
  0x2c   :  { %p478_p5 = scmp.ne.s32.totalorder %s41_s6, %s477_s23  ;;  %p483_p7 = scmp.lt.s32.totalorder %s477_s23, %s477_s23 }
  0x2e   :  { %p484_p8 = por %p483_p7, %p482_p6 }
  0x30   :  { %p485_p9 = pnand %p484_p8, %p478_p5 }
  0x32   :  { %488 = shalt.err (!%p485_p9)
}
  0x33   :  { %46 = dma.hbm_to_vmem [thread:$0]  %s652_s2, 640, %s41_s6, [#allocation6], %s542_s25, %s542_s25, %s543_s26  }
  0x34   :  { %s546_s27 = smov [#allocation8]   ;;  %s489_s5 = scalar_lea.hbm %s653_s3, 640 }
  0x35   :  { %s52_s28 = sshll.u32 %s546_s27, 4  ;;  %p490_p10 = scmp.ne.s32.totalorder %s653_s3, %s489_s5  ;;  %s53_s28 = int_to_ptr.vmem [resolvable:$true] %s52_s28 }
  0x36   :  { %p493_p11 = scmp.lt.u32.totalorder %s489_s5, %s653_s3 }
  0x38   :  { %p495_p12 = pnand %p493_p11, %p490_p10 }
  0x3a   :  { %498 = shalt.err (!%p495_p12)
}
  0x3b   :  { %s499_s11 = scalar_lea.vmem %s53_s28, 640  ;;  %p504_p0 = scmp.lt.s32.totalorder %s53_s28, %s53_s28 }
  0x3c   :  { %p500_p13 = scmp.ne.s32.totalorder %s53_s28, %s499_s11  ;;  %p505_p1 = scmp.lt.s32.totalorder %s499_s11, %s499_s11 }
  0x3e   :  { %p506_p2 = por %p505_p1, %p504_p0 }
  0x40   :  { %p507_p3 = pnand %p506_p2, %p500_p13 }
  0x42   :  { %510 = shalt.err (!%p507_p3)
}
  0x43   :  { %58 = dma.hbm_to_vmem [thread:$0]  %s653_s3, 640, %s53_s28, [#allocation9], %s542_s25, %s542_s25, %s543_s26  }
  0x44   :  { %533 = dma.done.wait [#allocation3], 32  }
  0x45   :  { %534 = vsyncadd [#allocation3], 4294967264 }
  0x46   :  { %535 = dma.done.wait [#allocation6], 1152  }
  0x47   :  { %536 = vsyncadd [#allocation6], 4294966144 }
  0x48   :  { %537 = dma.done.wait [#allocation9], 640  }
  0x49   :  { %538 = vsyncadd [#allocation9], 4294966656  ;;  %v547_v0 = vmov 0.0|0.0   ;;  %vm548_vm0 = vmmov 0   ;;  %v549_v1 = vmov 0.0   ;;  %v72_v2 = vld [vmem:[#allocation5] sm:$0xff] }
  0x4a   :  { %391 = vmatprep.subr.bf16.mxu0 %v547_v0  ;;  %362 = vmatprep.mubr.msk.f32.mxu0 %vm548_vm0, %v549_v1  ;;  %v73_v3 = vld [vmem:[#allocation5 + $0x8] sm:$0xff]  ;;  %v74_v4 = vld [vmem:[#allocation5 + $0x10] sm:$0xff]  ;;  %v75_v6 = vld [vmem:[#allocation5 + $0x18] sm:$0xff]  ;;  %vm76_vm1 = vcmask 261120   ;;  %vm150_vm2 = vcmask 320512   ;;  %vm162_vm3 = vcmask 326656  }
  0x4b   :  { %397 = vmatprep.subr.bf16.mxu1 %v547_v0  ;;  %375 = vmatprep.mubr.msk.f32.mxu1 %vm548_vm0, %v549_v1  ;;  %v392_v5 = vpack.c.bf16 %v73_v3, %v72_v2  ;;  %v395_v7 = vpack.c.bf16 %v75_v6, %v74_v4  ;;  %v71_v8 = vld [vmem:[#allocation2] sm:$0x3]  ;;  %v157_v12 = vld [vmem:[#allocation7] sm:$0xff]  ;;  %v158_v13 = vld [vmem:[#allocation7 + $0x8] sm:$0xff]  ;;  %s550_s3 = smov [#allocation10]  }
  0x4c   :  { %v398_v14 = vpack.c.bf16 %v158_v13, %v157_v12  ;;  %v159_v15 = vld [vmem:[#allocation7 + $0x10] sm:$0xff]  ;;  %v160_v16 = vld [vmem:[#allocation7 + $0x18] sm:$0xff]  ;;  %v161_v18 = vld [vmem:[#allocation7 + $0x20] sm:$0xff]  ;;  %s323_s25 = sshll.u32 %s550_s3, 4  ;;  %s324_s25 = int_to_ptr.vmem [resolvable:$true] %s323_s25 }
  0x4d   :  { %393 = vmatpush3.bf16.msra.mxu0 %v392_v5  ;;  %v401_v17 = vpack.c.bf16 %v160_v16, %v159_v15  ;;  %v238_v23 = vld [vmem:[#allocation8] sm:$0xff]  ;;  %v239_v24 = vld [vmem:[#allocation8 + $0x8] sm:$0xff]  ;;  %v240_v26 = vld [vmem:[#allocation8 + $0x10] sm:$0xff]  ;;  %s511_s26 = scalar_lea.vmem %s324_s25, 32  ;;  %p516_p5 = scmp.lt.s32.totalorder %s324_s25, %s324_s25 }
  0x4e   :  { %394 = vmatprep.subr.bf16.mxu0 %v547_v0  ;;  %399 = vmatpush3.bf16.msra.mxu1 %v398_v14  ;;  %v404_v25 = vpack.c.bf16 %v239_v24, %v238_v23  ;;  %v241_v27 = vld [vmem:[#allocation8 + $0x18] sm:$0xff]  ;;  %v242_v29 = vld [vmem:[#allocation8 + $0x20] sm:$0xff]  ;;  %p512_p4 = scmp.ne.s32.totalorder %s324_s25, %s511_s26  ;;  %p517_p6 = scmp.lt.s32.totalorder %s511_s26, %s511_s26 }
  0x4f   :  { %400 = vmatprep.subr.bf16.mxu1 %v547_v0  ;;  %v407_v28 = vpack.c.bf16 %v241_v27, %v240_v26 }
  0x50   :  { %p518_p7 = por %p517_p6, %p516_p5 }
  0x51   :  { %396 = vmatpush3.bf16.msra.mxu0 %v395_v7 }
  0x52   :  { %403 = vmatprep.subr.bf16.mxu0 %v547_v0  ;;  %402 = vmatpush3.bf16.msra.mxu1 %v401_v17  ;;  %p519_p8 = pnand %p518_p7, %p512_p4 }
  0x53   :  { %373 = vmatprep.subr.mxu1 %v549_v1 }
  0x54   :  { %363 = vmatmul.mubr.msk.f32.vlgmr.msra.gmra.mrb[0].mxu0 %vm76_vm1, %v71_v8 }
  0x55   :  { %388 = vmatprep.mubr.msk.f32.mxu0 %vm548_vm0, %v549_v1  ;;  %405 = vmatpush3.bf16.msra.mxu0 %v404_v25 }
  0x56   :  { %374 = vmatpush3.msra.mxu1 %v161_v18  ;;  %406 = vmatprep.subr.bf16.mxu0 %v547_v0 }
  0x59   :  { %408 = vmatpush3.bf16.msra.mxu0 %v407_v28 }
  0x5a   :  { %386 = vmatprep.subr.mxu0 %v549_v1 }
  0x5d   :  { %387 = vmatpush3.msra.mxu0 %v242_v29 }
 0x127   :  { %v146_v9 = vpop.f32.mrb[0].mxu0 }
 0x128   :  { %v364_v10 = vpop.f32.mrb[1].mxu0  ;;  %v151_v11 = vsel %vm150_vm2, %v146_v9, -inf }
 0x129   :  { %152 = vmax.xlane.f32.xlu0 %v151_v11 }
 0x1b6   :  { %v153_v19 = vpop.xlane.xlu0 %152 }
 0x1b7   :  { %v154_v20 = vsub.f32 %v146_v9, %v153_v19 }
 0x1b9   :  { %v155_v21 = vmul.f32 1.442695, %v154_v20 }
 0x1bb   :  { %419 = vpow2.f32 %v155_v21 }
 0x1c5   :  { %v420_v22 = vpop.eup %419 }
 0x1c6   :  { %376 = vmatmul.mubr.msk.f32.vlgmr.msra.gmra.mrb[0].mxu1 %vm162_vm3, %v420_v22 }
 0x299   :  { %v232_v30 = vpop.f32.mrb[0].mxu1 }
 0x29a   :  { %421 = vrcp.f32 %v232_v30  ;;  %v377_v31 = vpop.f32.mrb[1].mxu1 }
 0x2a4   :  { %v422_v32 = vpop.eup %421 }
 0x2a5   :  { %v237_v33 = vmul.f32 %v422_v32, %v420_v22 }
 0x2a7   :  { %389 = vmatmul.mubr.msk.f32.vlgmr.msra.gmra.mrb[2].mxu0 %vm162_vm3, %v237_v33 }
 0x37a   :  { %v312_v34 = vpop.f32.mrb[2].mxu0 }
 0x37b   :  { %316 = vst [vmem:[#allocation10] sm:$0x3] %v312_v34  ;;  %v390_v35 = vpop.f32.mrb[3].mxu0 }
 0x37c   :  { %522 = shalt.err (!%p519_p8)
}
 0x37d   :  { %s523_s1 = scalar_lea.hbm %s654_s4, 32 }
 0x37e   :  { %p524_p9 = scmp.ne.s32.totalorder %s654_s4, %s523_s1  ;;  %p527_p10 = scmp.lt.u32.totalorder %s523_s1, %s654_s4 }
 0x380   :  { %p529_p11 = pnand %p527_p10, %p524_p9 }
 0x382   :  { %532 = shalt.err (!%p529_p11)
}
 0x383   :  { %326 = dma.vmem_to_hbm [thread:$0]  %s324_s25, 32, %s654_s4, [#allocation4]  }
 0x384   :  { %539 = dma.done.wait [#allocation4], 32  }
 0x385   :  { %540 = vsyncadd [#allocation4], 4294967264 }
 0x386   :  { %330 = vsyncpa [#allocation3], 1 }
 0x387   :  { %331 = vsyncpa [#allocation6], 1 }
 0x388   :  { %332 = vsyncpa [#allocation9], 1 }
 0x389   :  { %333 = vsyncpa [#allocation4], 1 }

</bundles_post_ra>
